<compile_context>
chip_gen: v5e
topology: v5e:2x2
jax: 0.10.0
libtpu: 0.0.40
codegen_flags: <defaults>
</compile_context>

<pallas_src>
import functools

import jax
import jax.numpy as jnp
from jax import lax
from jax.experimental import pallas as pl
from jax.experimental.pallas import tpu as pltpu


def _round_up(x, m):
    return ((x + m - 1) // m) * m


def actor_kernel(x_ref, w1_ref, b1_ref, w2_ref, b2_ref, w3_ref, b3_ref, out_ref):
    x = x_ref[...]                                    # [TB, state_dim]

    # fc1 + relu: contract on the feature axis (no physical transpose of x).
    # [64, state_dim] x [TB, state_dim] -> [64, TB]  (batch on lanes)
    h1 = lax.dot_general(
        w1_ref[...], x, (((1,), (1,)), ((), ())),
        preferred_element_type=jnp.float32) + b1_ref[...]
    h1 = jnp.maximum(h1, 0.0)

    # fc2 + relu: [32, 64] @ [64, TB] -> [32, TB]
    h2 = jnp.dot(w2_ref[...], h1, preferred_element_type=jnp.float32) + b2_ref[...]
    h2 = jnp.maximum(h2, 0.0)

    # fc3: [action_dim, 32] @ [32, TB] -> [action_dim, TB]
    logits = jnp.dot(w3_ref[...], h2, preferred_element_type=jnp.float32) + b3_ref[...]

    # softmax over the action axis (axis 0 = sublanes), numerically stable.
    m = jnp.max(logits, axis=0, keepdims=True)        # [1, TB]
    e = jnp.exp(logits - m)                           # [action_dim, TB]
    s = jnp.sum(e, axis=0, keepdims=True)             # [1, TB]
    out_ref[...] = e * pl.reciprocal(s, approx=True)


@functools.partial(jax.jit, static_argnames=("block_b",))
def actor_forward(x, params, *, block_b=128 * 1024):
    """x: [B, state_dim] float32.
    params: torch-layout weights w{1,2,3}: [out, in], biases b{1,2,3}: [out, 1].
    Returns softmax probabilities [B, action_dim]."""
    B, state_dim = x.shape
    action_dim = params["w3"].shape[0]

    # Lane-aligned batch tile: multiple of 128, large enough to amortize
    # per-grid-step overhead, capped by block_b (keeps double-buffered VMEM
    # well under v5e's 16 MiB scoped default / v7x's 64 MiB per-TC).
    block_b = max(128, (block_b // 128) * 128)
    Bp0 = _round_up(B, 128)
    tb = min(block_b, Bp0)
    # Split into >= 2 tiles when possible so v7x's two TensorCores both work.
    if pl.cdiv(Bp0, tb) == 1 and Bp0 >= 256:
        tb = _round_up(Bp0 // 2, 128)
    num_tiles = pl.cdiv(Bp0, tb)
    Bp = num_tiles * tb

    xp = x if Bp == B else jnp.pad(x, ((0, Bp - B), (0, 0)))

    w_bytes = 4 * (64 * state_dim + 64 + 32 * 64 + 32 + action_dim * 32 + action_dim)
    cost = pl.CostEstimate(
        flops=2 * Bp * (state_dim * 64 + 64 * 32 + 32 * action_dim),
        transcendentals=Bp * (action_dim + 1),
        bytes_accessed=Bp * 4 * (state_dim + action_dim) + w_bytes,
    )

    keep = lambda i: (0, 0)                           # weights resident across grid
    out_t = pl.pallas_call(
        actor_kernel,
        out_shape=jax.ShapeDtypeStruct((action_dim, Bp), jnp.float32),
        grid=(num_tiles,),
        in_specs=[
            pl.BlockSpec((tb, state_dim), lambda i: (i, 0)),   # x tile, native layout
            pl.BlockSpec((64, state_dim), keep),               # w1
            pl.BlockSpec((64, 1), keep),                       # b1
            pl.BlockSpec((32, 64), keep),                      # w2
            pl.BlockSpec((32, 1), keep),                       # b2
            pl.BlockSpec((action_dim, 32), keep),              # w3
            pl.BlockSpec((action_dim, 1), keep),               # b3
        ],
        out_specs=pl.BlockSpec((action_dim, tb), lambda i: (0, i)),  # lane-dense out
        compiler_params=pltpu.CompilerParams(
            dimension_semantics=("parallel",),        # megacore-shard batch on v7x
        ),
        cost_estimate=cost,
    )(xp, params["w1"], params["b1"], params["w2"], params["b2"],
      params["w3"], params["b3"])

    # Tiny [action_dim, B] -> [B, action_dim] epilogue (8 B/sample), fused by jit.
    return out_t[:, :B].T


def init_params(key, state_dim, action_dim):
    """PyTorch-style Linear init (uniform +/- 1/sqrt(fan_in)).
    Weights are torch-native [out, in]; biases are [out, 1] (lane broadcast)."""
    def linear(key, fan_in, fan_out):
        kw, kb = jax.random.split(key)
        bound = 1.0 / jnp.sqrt(fan_in)
        w = jax.random.uniform(kw, (fan_out, fan_in), jnp.float32, -bound, bound)
        b = jax.random.uniform(kb, (fan_out, 1), jnp.float32, -bound, bound)
        return w, b

    k1, k2, k3 = jax.random.split(key, 3)
    w1, b1 = linear(k1, state_dim, 64)
    w2, b2 = linear(k2, 64, 32)
    w3, b3 = linear(k3, 32, action_dim)
    return {"w1": w1, "b1": b1, "w2": w2, "b2": b2, "w3": w3, "b3": b3}


def actor_reference(x, p):
    """Plain-JAX reference (torch semantics: y = x @ W.T + b)."""
    h1 = jnp.maximum(x @ p["w1"].T + p["b1"].T, 0.0)
    h2 = jnp.maximum(h1 @ p["w2"].T + p["b2"].T, 0.0)
    logits = h2 @ p["w3"].T + p["b3"].T
    return jax.nn.softmax(logits, axis=1)


if __name__ == "__main__":
    state_dim = 4      # CartPole observation dim
    action_dim = 2     # CartPole action dim

    key = jax.random.PRNGKey(0)
    kx, kp, kx2 = jax.random.split(key, 3)
    params = init_params(kp, state_dim, action_dim)

    # Small batch (single tile path).
    batch = 8
    x = jax.random.normal(kx, (batch, state_dim), jnp.float32)
    out = jax.block_until_ready(actor_forward(x, params))
    ref = actor_reference(x, params)
    assert out.shape == (batch, action_dim)
    # tolerance covers the EUP approximate reciprocal in the softmax divide
    assert jnp.allclose(out, ref, atol=2e-3, rtol=2e-3)
    assert jnp.allclose(jnp.sum(out, axis=1), jnp.ones((batch,)), atol=2e-3)

    # Larger batch exercising the multi-tile (2 grid steps) + padding path.
    batch2 = 300
    x2 = jax.random.normal(kx2, (batch2, state_dim), jnp.float32)
    out2 = jax.block_until_ready(actor_forward(x2, params))
    ref2 = actor_reference(x2, params)
    assert out2.shape == (batch2, action_dim)
    assert jnp.allclose(out2, ref2, atol=2e-3, rtol=2e-3)

    print("KERNEL_OK")
</pallas_src>

<mosaic_0001>
module attributes {stable_mosaic.version = 11 : i64} {
  func.func @actor_kernel(%arg0: i32, %arg1: memref<128x4xf32, #tpu.memory_space<vmem>>, %arg2: memref<64x4xf32, #tpu.memory_space<vmem>>, %arg3: memref<64x1xf32, #tpu.memory_space<vmem>>, %arg4: memref<32x64xf32, #tpu.memory_space<vmem>>, %arg5: memref<32x1xf32, #tpu.memory_space<vmem>>, %arg6: memref<2x32xf32, #tpu.memory_space<vmem>>, %arg7: memref<2x1xf32, #tpu.memory_space<vmem>>, %arg8: memref<2x128xf32, #tpu.memory_space<vmem>>) attributes {dimension_semantics = [#tpu.dimension_semantics<parallel>], iteration_bounds = array<i64: 1>, scalar_prefetch = 0 : i64, scratch_operands = 0 : i64, tpu.core_type = #tpu.core_type<tc>, window_params = [{transform_indices = @transform_0, window_bounds = array<i64: 128, 4>}, {pipeline_mode = #tpu.pipeline_mode<synchronous>, transform_indices = @transform_1, window_bounds = array<i64: 64, 4>}, {pipeline_mode = #tpu.pipeline_mode<synchronous>, transform_indices = @transform_2, window_bounds = array<i64: 64, 1>}, {pipeline_mode = #tpu.pipeline_mode<synchronous>, transform_indices = @transform_3, window_bounds = array<i64: 32, 64>}, {pipeline_mode = #tpu.pipeline_mode<synchronous>, transform_indices = @transform_4, window_bounds = array<i64: 32, 1>}, {pipeline_mode = #tpu.pipeline_mode<synchronous>, transform_indices = @transform_5, window_bounds = array<i64: 2, 32>}, {pipeline_mode = #tpu.pipeline_mode<synchronous>, transform_indices = @transform_6, window_bounds = array<i64: 2, 1>}, {transform_indices = @transform_7, window_bounds = array<i64: 2, 128>}]} {
    %c0 = arith.constant 0 : index
    %c0_0 = arith.constant 0 : index
    %0 = vector.load %arg1[%c0, %c0_0] : memref<128x4xf32, #tpu.memory_space<vmem>>, vector<128x4xf32>
    %c0_1 = arith.constant 0 : index
    %c0_2 = arith.constant 0 : index
    %1 = vector.load %arg2[%c0_1, %c0_2] : memref<64x4xf32, #tpu.memory_space<vmem>>, vector<64x4xf32>
    %cst = arith.constant dense<0.000000e+00> : vector<64x128xf32>
    %2 = tpu.matmul %1, %0, %cst {dimension_numbers = #tpu.dot_dimension_numbers<[1], [1], [0], [0], [0, 0, 1, 0], [], []>} : vector<64x4xf32>, vector<128x4xf32>, vector<64x128xf32> -> vector<64x128xf32>
    %c0_3 = arith.constant 0 : index
    %c0_4 = arith.constant 0 : index
    %3 = vector.load %arg3[%c0_3, %c0_4] : memref<64x1xf32, #tpu.memory_space<vmem>>, vector<64x1xf32>
    %4 = vector.broadcast %3 : vector<64x1xf32> to vector<64x128xf32>
    %5 = arith.addf %2, %4 : vector<64x128xf32>
    %cst_5 = arith.constant 0.000000e+00 : f32
    %6 = vector.broadcast %cst_5 : f32 to vector<64x128xf32>
    %7 = arith.maximumf %5, %6 : vector<64x128xf32>
    %c0_6 = arith.constant 0 : index
    %c0_7 = arith.constant 0 : index
    %8 = vector.load %arg4[%c0_6, %c0_7] : memref<32x64xf32, #tpu.memory_space<vmem>>, vector<32x64xf32>
    %cst_8 = arith.constant dense<0.000000e+00> : vector<32x128xf32>
    %9 = tpu.matmul %8, %7, %cst_8 {dimension_numbers = #tpu.dot_dimension_numbers<[1], [0], [0], [1], [0, 0, 1, 1], [], []>} : vector<32x64xf32>, vector<64x128xf32>, vector<32x128xf32> -> vector<32x128xf32>
    %c0_9 = arith.constant 0 : index
    %c0_10 = arith.constant 0 : index
    %10 = vector.load %arg5[%c0_9, %c0_10] : memref<32x1xf32, #tpu.memory_space<vmem>>, vector<32x1xf32>
    %11 = vector.broadcast %10 : vector<32x1xf32> to vector<32x128xf32>
    %12 = arith.addf %9, %11 : vector<32x128xf32>
    %cst_11 = arith.constant 0.000000e+00 : f32
    %13 = vector.broadcast %cst_11 : f32 to vector<32x128xf32>
    %14 = arith.maximumf %12, %13 : vector<32x128xf32>
    %c0_12 = arith.constant 0 : index
    %c0_13 = arith.constant 0 : index
    %15 = vector.load %arg6[%c0_12, %c0_13] : memref<2x32xf32, #tpu.memory_space<vmem>>, vector<2x32xf32>
    %cst_14 = arith.constant dense<0.000000e+00> : vector<2x128xf32>
    %16 = tpu.matmul %15, %14, %cst_14 {dimension_numbers = #tpu.dot_dimension_numbers<[1], [0], [0], [1], [0, 0, 1, 1], [], []>} : vector<2x32xf32>, vector<32x128xf32>, vector<2x128xf32> -> vector<2x128xf32>
    %c0_15 = arith.constant 0 : index
    %c0_16 = arith.constant 0 : index
    %17 = vector.load %arg7[%c0_15, %c0_16] : memref<2x1xf32, #tpu.memory_space<vmem>>, vector<2x1xf32>
    %18 = vector.broadcast %17 : vector<2x1xf32> to vector<2x128xf32>
    %19 = arith.addf %16, %18 : vector<2x128xf32>
    %cst_17 = arith.constant dense<0xFF800000> : vector<128xf32>
    %20 = vector.multi_reduction <maximumf>, %19, %cst_17 [0] : vector<2x128xf32> to vector<128xf32>
    %21 = vector.shape_cast %20 : vector<128xf32> to vector<1x128xf32>
    %22 = vector.broadcast %21 : vector<1x128xf32> to vector<2x128xf32>
    %23 = arith.subf %19, %22 : vector<2x128xf32>
    %24 = math.exp %23 : vector<2x128xf32>
    %cst_18 = arith.constant dense<0.000000e+00> : vector<128xf32>
    %25 = vector.multi_reduction <add>, %24, %cst_18 [0] : vector<2x128xf32> to vector<128xf32>
    %26 = vector.shape_cast %25 : vector<128xf32> to vector<1x128xf32>
    %27 = tpu.reciprocal %26 {approx = true} : vector<1x128xf32> -> vector<1x128xf32>
    %28 = vector.broadcast %27 : vector<1x128xf32> to vector<2x128xf32>
    %29 = arith.mulf %24, %28 : vector<2x128xf32>
    %c0_19 = arith.constant 0 : index
    %c0_20 = arith.constant 0 : index
    %30 = vector.load %arg8[%c0_19, %c0_20] : memref<2x128xf32, #tpu.memory_space<vmem>>, vector<2x128xf32>
    tpu.vector_store %arg8[%c0_19, %c0_20], %29 {strides = array<i32>} : memref<2x128xf32, #tpu.memory_space<vmem>>, vector<2x128xf32>,
    return
  }
  func.func @transform_0(%arg0: i32) -> (i32, i32) {
    %c0_i32 = arith.constant 0 : i32
    %c0_i32_0 = arith.constant 0 : i32
    return %arg0, %c0_i32 : i32, i32
  }
  func.func @transform_1(%arg0: i32) -> (i32, i32) {
    %c0_i32 = arith.constant 0 : i32
    %c0_i32_0 = arith.constant 0 : i32
    %c0_i32_1 = arith.constant 0 : i32
    return %c0_i32, %c0_i32_0 : i32, i32
  }
  func.func @transform_2(%arg0: i32) -> (i32, i32) {
    %c0_i32 = arith.constant 0 : i32
    %c0_i32_0 = arith.constant 0 : i32
    %c0_i32_1 = arith.constant 0 : i32
    return %c0_i32, %c0_i32_0 : i32, i32
  }
  func.func @transform_3(%arg0: i32) -> (i32, i32) {
    %c0_i32 = arith.constant 0 : i32
    %c0_i32_0 = arith.constant 0 : i32
    %c0_i32_1 = arith.constant 0 : i32
    return %c0_i32, %c0_i32_0 : i32, i32
  }
  func.func @transform_4(%arg0: i32) -> (i32, i32) {
    %c0_i32 = arith.constant 0 : i32
    %c0_i32_0 = arith.constant 0 : i32
    %c0_i32_1 = arith.constant 0 : i32
    return %c0_i32, %c0_i32_0 : i32, i32
  }
  func.func @transform_5(%arg0: i32) -> (i32, i32) {
    %c0_i32 = arith.constant 0 : i32
    %c0_i32_0 = arith.constant 0 : i32
    %c0_i32_1 = arith.constant 0 : i32
    return %c0_i32, %c0_i32_0 : i32, i32
  }
  func.func @transform_6(%arg0: i32) -> (i32, i32) {
    %c0_i32 = arith.constant 0 : i32
    %c0_i32_0 = arith.constant 0 : i32
    %c0_i32_1 = arith.constant 0 : i32
    return %c0_i32, %c0_i32_0 : i32, i32
  }
  func.func @transform_7(%arg0: i32) -> (i32, i32) {
    %c0_i32 = arith.constant 0 : i32
    %c0_i32_0 = arith.constant 0 : i32
    return %c0_i32, %arg0 : i32, i32
  }
}

</mosaic_0001>

<bundles_post_ra>
// kernel: actor_forward.1
= control target key start
LH: loop header
LB: loop body
LE: loop exit
PB: predicated region body
PF: predicated region fallthrough
CT: control target
= control target key end

     0   :  { %vm98_vm0 = vcmask 31744   ;;  %v419_v9 = vmov 0   ;;  %vm248_vm1 = vcmask 523264   ;;  %vm301_vm2 = vcmask 261120   ;;  %s645_s0 = inlined_call_operand.vmem [shape: f32[128,4], index: 0, kind: input, shape index: {}]   ;;  %s646_s2 = inlined_call_operand.vmem [shape: f32[64,1], index: 2, kind: input, shape index: {}]   ;;  %s647_s4 = inlined_call_operand.vmem [shape: f32[32,1], index: 4, kind: input, shape index: {}]   ;;  %s648_s1 = inlined_call_operand.vmem [shape: f32[64,4], index: 1, kind: input, shape index: {}]   ;;  %s649_s6 = inlined_call_operand.vmem [shape: f32[2,1], index: 6, kind: input, shape index: {}]   ;;  %s650_s3 = inlined_call_operand.vmem [shape: f32[32,64], index: 3, kind: input, shape index: {}]   ;;  %s651_s5 = inlined_call_operand.vmem [shape: f32[2,32], index: 5, kind: input, shape index: {}]   ;;  %s652_s7 = inlined_call_operand.vmem [shape: f32[2,128], index: 7, kind: output, shape index: {}]  }
   0x1   :  { %v41_v0 = vld [vmem:[%s645_s0 + $0x78] sm:$0xff]  ;;  %v40_v1 = vld [vmem:[%s645_s0 + $0x70] sm:$0xff]  ;;  %v39_v2 = vld [vmem:[%s645_s0 + $0x68] sm:$0xff]  ;;  %412 = vset.pattern.permute.xlu0 %v419_v9  ;;  %413 = vset.pattern.permute.xlu1 %v419_v9  ;;  %vm325_vm3 = vcmask 1041408  }
   0x2   :  { %379 = vmatpush.xpose.msk.msra.mxu2 %vm98_vm0, %v41_v0  ;;  %380 = vmatpush.xpose.msk.msra.mxu3 %vm98_vm0, %v41_v0  ;;  %v38_v3 = vld [vmem:[%s645_s0 + $0x60] sm:$0xff]  ;;  %v37_v4 = vld [vmem:[%s645_s0 + $0x58] sm:$0xff]  ;;  %v36_v5 = vld [vmem:[%s645_s0 + $0x50] sm:$0xff] }
   0x3   :  { %350 = vmatpush.xpose.msk.msra.mxu0 %vm98_vm0, %v41_v0  ;;  %v35_v6 = vld [vmem:[%s645_s0 + $0x48] sm:$0xff]  ;;  %v34_v7 = vld [vmem:[%s645_s0 + $0x40] sm:$0xff]  ;;  %v33_v8 = vld [vmem:[%s645_s0 + $0x38] sm:$0xff]  ;;  %414 = vset.pattern.permute.xlu2 %v419_v9 }
   0x4   :  { %v57_v10 = vld [vmem:[%s646_s2 + $0x38] sm:$0xff]  ;;  %v32_v11 = vld [vmem:[%s645_s0 + $0x30] sm:$0xff]  ;;  %v31_v12 = vld [vmem:[%s645_s0 + $0x28] sm:$0xff] }
   0x5   :  { %95 = vperm.xlu0 %412, %v57_v10   ;;  %v56_v13 = vld [vmem:[%s646_s2 + $0x30] sm:$0xff]  ;;  %v30_v14 = vld [vmem:[%s645_s0 + $0x20] sm:$0xff]  ;;  %v29_v15 = vld [vmem:[%s645_s0 + $0x18] sm:$0xff] }
   0x6   :  { %381 = vmatpush.xpose.msk.msra.mxu2 %vm98_vm0, %v40_v1  ;;  %382 = vmatpush.xpose.msk.msra.mxu3 %vm98_vm0, %v40_v1  ;;  %v51_v16 = vld [vmem:[%s646_s2 + $0x8] sm:$0xff]  ;;  %v28_v18 = vld [vmem:[%s645_s0 + $0x10] sm:$0xff]  ;;  %v54_v20 = vld [vmem:[%s646_s2 + $0x20] sm:$0xff] }
   0x7   :  { %351 = vmatpush.xpose.msk.msra.mxu0 %vm98_vm0, %v40_v1  ;;  %v55_v17 = vld [vmem:[%s646_s2 + $0x28] sm:$0xff]  ;;  %v226_v21 = vld [vmem:[%s647_s4 + $0x10] sm:$0xff]  ;;  %v26_v22 = vld [vmem:[%s645_s0] sm:$0xff] }
   0x8   :  { %85 = vperm.xlu1 %413, %v55_v17   ;;  %v27_v19 = vld [vmem:[%s645_s0 + $0x8] sm:$0xff]  ;;  %v48_v24 = vld [vmem:[%s648_s1 + $0x30] sm:$0xff]  ;;  %v42_v25 = vld [vmem:[%s648_s1] sm:$0xff] }
   0x9   :  { %v43_v23 = vld [vmem:[%s648_s1 + $0x8] sm:$0xff]  ;;  %v50_v26 = vld [vmem:[%s646_s2] sm:$0xff]  ;;  %v53_v28 = vld [vmem:[%s646_s2 + $0x18] sm:$0xff] }
   0xa   :  { %383 = vmatpush.xpose.msk.msra.mxu2 %vm98_vm0, %v39_v2  ;;  %384 = vmatpush.xpose.msk.msra.mxu3 %vm98_vm0, %v39_v2  ;;  %v295_v27 = vld [vmem:[%s649_s6] sm:$0x3]  ;;  %v44_v29 = vld [vmem:[%s648_s1 + $0x10] sm:$0xff]  ;;  %v49_v30 = vld [vmem:[%s648_s1 + $0x38] sm:$0xff] }
   0xb   :  { %352 = vmatpush.xpose.msk.msra.mxu0 %vm98_vm0, %v39_v2  ;;  %75 = vperm.xlu2 %414, %v53_v28   ;;  %v52_v31 = vld [vmem:[%s646_s2 + $0x10] sm:$0xff]  ;;  %v225_v32 = vld [vmem:[%s647_s4 + $0x8] sm:$0xff]  ;;  %v45_v33 = vld [vmem:[%s648_s1 + $0x18] sm:$0xff] }
   0xc   :  { %v227_v34 = vld [vmem:[%s647_s4 + $0x18] sm:$0xff]  ;;  %v46_v35 = vld [vmem:[%s648_s1 + $0x20] sm:$0xff]  ;;  %v47_v37 = vld [vmem:[%s648_s1 + $0x28] sm:$0xff] }
   0xd   :  { %90 = vperm.xlu0 %412, %v56_v13   ;;  %v224_v36 = vld [vmem:[%s647_s4] sm:$0xff]  ;;  %v223_v9 = vld [vmem:[%s650_s3 + $0x18] sm:$0xff] }
   0xe   :  { %385 = vmatpush.xpose.msk.msra.mxu2 %vm98_vm0, %v38_v3  ;;  %386 = vmatpush.xpose.msk.msra.mxu3 %vm98_vm0, %v38_v3 }
   0xf   :  { %353 = vmatpush.xpose.msk.msra.mxu0 %vm98_vm0, %v38_v3 }
  0x10   :  { %80 = vperm.xlu1 %413, %v54_v20  }
  0x12   :  { %387 = vmatpush.xpose.msk.msra.mxu2 %vm98_vm0, %v37_v4  ;;  %388 = vmatpush.xpose.msk.msra.mxu3 %vm98_vm0, %v37_v4 }
  0x13   :  { %354 = vmatpush.xpose.msk.msra.mxu0 %vm98_vm0, %v37_v4  ;;  %70 = vperm.xlu2 %414, %v52_v31  }
  0x15   :  { %65 = vperm.xlu0 %412, %v51_v16  }
  0x16   :  { %389 = vmatpush.xpose.msk.msra.mxu2 %vm98_vm0, %v36_v5  ;;  %390 = vmatpush.xpose.msk.msra.mxu3 %vm98_vm0, %v36_v5 }
  0x17   :  { %355 = vmatpush.xpose.msk.msra.mxu0 %vm98_vm0, %v36_v5 }
  0x18   :  { %60 = vperm.xlu1 %413, %v50_v26   ;;  %v294_v26 = vld [vmem:[%s651_s5] sm:$0x3] }
  0x1a   :  { %391 = vmatpush.xpose.msk.msra.mxu2 %vm98_vm0, %v35_v6  ;;  %392 = vmatpush.xpose.msk.msra.mxu3 %vm98_vm0, %v35_v6 }
  0x1b   :  { %356 = vmatpush.xpose.msk.msra.mxu0 %vm98_vm0, %v35_v6  ;;  %245 = vperm.xlu2 %414, %v227_v34   ;;  %v220_v6 = vld [vmem:[%s650_s3] sm:$0xff] }
  0x1d   :  { %240 = vperm.xlu0 %412, %v226_v21  }
  0x1e   :  { %393 = vmatpush.xpose.msk.msra.mxu2 %vm98_vm0, %v34_v7  ;;  %394 = vmatpush.xpose.msk.msra.mxu3 %vm98_vm0, %v34_v7 }
  0x1f   :  { %357 = vmatpush.xpose.msk.msra.mxu0 %vm98_vm0, %v34_v7  ;;  %v221_v7 = vld [vmem:[%s650_s3 + $0x8] sm:$0xff] }
  0x20   :  { %235 = vperm.xlu1 %413, %v225_v32  }
  0x22   :  { %395 = vmatpush.xpose.msk.msra.mxu2 %vm98_vm0, %v33_v8  ;;  %396 = vmatpush.xpose.msk.msra.mxu3 %vm98_vm0, %v33_v8 }
  0x23   :  { %358 = vmatpush.xpose.msk.msra.mxu0 %vm98_vm0, %v33_v8  ;;  %230 = vperm.xlu2 %414, %v224_v36   ;;  %v222_v8 = vld [vmem:[%s650_s3 + $0x10] sm:$0xff] }
  0x25   :  { %298 = vperm.xlu0 %412, %v295_v27  }
  0x26   :  { %397 = vmatpush.xpose.msk.msra.mxu2 %vm98_vm0, %v32_v11  ;;  %398 = vmatpush.xpose.msk.msra.mxu3 %vm98_vm0, %v32_v11 }
  0x27   :  { %359 = vmatpush.xpose.msk.msra.mxu0 %vm98_vm0, %v32_v11 }
  0x2a   :  { %399 = vmatpush.xpose.msk.msra.mxu2 %vm98_vm0, %v31_v12  ;;  %400 = vmatpush.xpose.msk.msra.mxu3 %vm98_vm0, %v31_v12 }
  0x2b   :  { %360 = vmatpush.xpose.msk.msra.mxu0 %vm98_vm0, %v31_v12 }
  0x2e   :  { %401 = vmatpush.xpose.msk.msra.mxu2 %vm98_vm0, %v30_v14  ;;  %402 = vmatpush.xpose.msk.msra.mxu3 %vm98_vm0, %v30_v14 }
  0x2f   :  { %361 = vmatpush.xpose.msk.msra.mxu0 %vm98_vm0, %v30_v14 }
  0x32   :  { %403 = vmatpush.xpose.msk.msra.mxu2 %vm98_vm0, %v29_v15  ;;  %404 = vmatpush.xpose.msk.msra.mxu3 %vm98_vm0, %v29_v15 }
  0x33   :  { %362 = vmatpush.xpose.msk.msra.mxu0 %vm98_vm0, %v29_v15 }
  0x36   :  { %405 = vmatpush.xpose.msk.msra.mxu2 %vm98_vm0, %v28_v18  ;;  %406 = vmatpush.xpose.msk.msra.mxu3 %vm98_vm0, %v28_v18 }
  0x37   :  { %363 = vmatpush.xpose.msk.msra.mxu0 %vm98_vm0, %v28_v18 }
  0x3a   :  { %407 = vmatpush.xpose.msk.msra.mxu2 %vm98_vm0, %v27_v19  ;;  %408 = vmatpush.xpose.msk.msra.mxu3 %vm98_vm0, %v27_v19 }
  0x3b   :  { %364 = vmatpush.xpose.msk.msra.mxu0 %vm98_vm0, %v27_v19 }
  0x3e   :  { %409 = vmatpush.xpose.msk.msra.mxu2 %vm98_vm0, %v26_v22  ;;  %410 = vmatpush.xpose.msk.msra.mxu3 %vm98_vm0, %v26_v22 }
  0x3f   :  { %365 = vmatpush.xpose.msk.msra.mxu0 %vm98_vm0, %v26_v22 }
  0x41   :  { %367 = vmatmul.msk.f32.vlgmr.msra.gmra.mxu2 %vm98_vm0, %v43_v23  ;;  %372 = vmatmul.msk.f32.vlgmr.msra.gmra.mxu3 %vm98_vm0, %v48_v24 }
  0x42   :  { %366 = vmatmul.msk.f32.vlgmr.msra.gmra.mxu0 %vm98_vm0, %v42_v25 }
  0x49   :  { %368 = vmatmul.msk.f32.gmra.mxu2 %vm98_vm0, %v44_v29  ;;  %373 = vmatmul.msk.f32.gmra.mxu3 %vm98_vm0, %v49_v30 }
  0x51   :  { %369 = vmatmul.msk.f32.gmra.mxu2 %vm98_vm0, %v45_v33 }
  0x59   :  { %370 = vmatmul.msk.f32.gmra.mxu2 %vm98_vm0, %v46_v35 }
  0x61   :  { %371 = vmatmul.msk.f32.gmra.mxu2 %vm98_vm0, %v47_v37 }
  0x65   :  { %v76_v50 = vpop.permute.xlu2 %75 }
  0x6d   :  { %v71_v56 = vpop.permute.xlu2 %70 }
  0x75   :  { %v246_v13 = vpop.permute.xlu2 %245 }
  0x77   :  { %v96_v38 = vpop.permute.xlu0 %95 }
  0x7a   :  { %v86_v49 = vpop.permute.xlu1 %85 }
  0x7d   :  { %v231_v21 = vpop.permute.xlu2 %230 }
  0x7f   :  { %v91_v41 = vpop.permute.xlu0 %90 }
  0x82   :  { %v81_v52 = vpop.permute.xlu1 %80 }
  0x87   :  { %v66_v59 = vpop.permute.xlu0 %65 }
  0x8a   :  { %v61_v1 = vpop.permute.xlu1 %60 }
  0x8f   :  { %v241_v14 = vpop.permute.xlu0 %240 }
  0x92   :  { %v236_v18 = vpop.permute.xlu1 %235 }
  0x97   :  { %v299_v27 = vpop.permute.xlu0 %298 }
  0xbf   :  { %v188_v62 = vpop.f32.mrf.mxu0 }
  0xc0   :  { %v189_v3 = vadd.f32 %v188_v62, %v61_v1 }
  0xc2   :  { %v212_v5 = vmax.f32 %v189_v3, 0.0 }
  0xc4   :  { %v191_v39 = vpop.f32.mrf.mxu2  ;;  %v206_v40 = vpop.f32.mrf.mxu3 }
  0xc5   :  { %v207_v42 = vadd.f32 %v206_v40, %v91_v41  ;;  %v192_v63 = vadd.f32 %v191_v39, %v66_v59 }
  0xc7   :  { %v218_v46 = vmax.f32 %v207_v42, 0.0  ;;  %v213_v4 = vmax.f32 %v192_v63, 0.0 }
  0xcc   :  { %v194_v43 = vpop.f32.mrf.mxu2  ;;  %v209_v44 = vpop.f32.mrf.mxu3 }
  0xcd   :  { %v210_v45 = vadd.f32 %v209_v44, %v96_v38  ;;  %v195_v60 = vadd.f32 %v194_v43, %v71_v56 }
  0xcf   :  { %v219_v47 = vmax.f32 %v210_v45, 0.0  ;;  %v214_v2 = vmax.f32 %v195_v60, 0.0 }
  0xd1   :  { %269 = vmatpush.msra.mxu1 %v219_v47 }
  0xd3   :  { %270 = vmatpush.msra.mxu1 %v218_v46 }
  0xd4   :  { %v197_v48 = vpop.f32.mrf.mxu2 }
  0xd5   :  { %v198_v57 = vadd.f32 %v197_v48, %v76_v50 }
  0xd7   :  { %v215_v0 = vmax.f32 %v198_v57, 0.0 }
  0xdc   :  { %v200_v51 = vpop.f32.mrf.mxu2 }
  0xdd   :  { %v201_v54 = vadd.f32 %v200_v51, %v81_v52 }
  0xdf   :  { %v216_v61 = vmax.f32 %v201_v54, 0.0 }
  0xe4   :  { %v203_v53 = vpop.f32.mrf.mxu2 }
  0xe5   :  { %v204_v55 = vadd.f32 %v203_v53, %v86_v49 }
  0xe7   :  { %v217_v58 = vmax.f32 %v204_v55, 0.0 }
  0xe9   :  { %271 = vmatpush.msra.mxu1 %v217_v58 }
  0xeb   :  { %272 = vmatpush.msra.mxu1 %v216_v61 }
  0xed   :  { %273 = vmatpush.msra.mxu1 %v215_v0 }
  0xef   :  { %274 = vmatpush.msra.mxu1 %v214_v2 }
  0xf1   :  { %275 = vmatpush.msra.mxu1 %v213_v4 }
  0xf3   :  { %276 = vmatpush.msra.mxu1 %v212_v5 }
  0xf4   :  { %374 = vmatmul.msk.f32.vlgmr.msra.gmra.mxu1 %vm248_vm1, %v220_v6 }
  0xfc   :  { %375 = vmatmul.msk.f32.gmra.mxu1 %vm248_vm1, %v221_v7 }
 0x104   :  { %376 = vmatmul.msk.f32.gmra.mxu1 %vm248_vm1, %v222_v8 }
 0x10c   :  { %377 = vmatmul.msk.f32.gmra.mxu1 %vm248_vm1, %v223_v9 }
 0x171   :  { %v278_v10 = vpop.f32.mrf.mxu1 }
 0x172   :  { %v279_v22 = vadd.f32 %v278_v10, %v231_v21 }
 0x174   :  { %v290_v25 = vmax.f32 %v279_v22, 0.0 }
 0x179   :  { %v281_v11 = vpop.f32.mrf.mxu1 }
 0x17a   :  { %v282_v19 = vadd.f32 %v281_v11, %v236_v18 }
 0x17c   :  { %v291_v24 = vmax.f32 %v282_v19, 0.0 }
 0x181   :  { %v284_v12 = vpop.f32.mrf.mxu1 }
 0x182   :  { %v285_v16 = vadd.f32 %v284_v12, %v241_v14 }
 0x184   :  { %v292_v23 = vmax.f32 %v285_v16, 0.0 }
 0x189   :  { %v287_v15 = vpop.f32.mrf.mxu1 }
 0x18a   :  { %v288_v17 = vadd.f32 %v287_v15, %v246_v13 }
 0x18c   :  { %v293_v20 = vmax.f32 %v288_v17, 0.0 }
 0x18e   :  { %317 = vmatpush.msrb.mxu1 %v293_v20 }
 0x190   :  { %318 = vmatpush.msrb.mxu1 %v292_v23 }
 0x192   :  { %319 = vmatpush.msrb.mxu1 %v291_v24 }
 0x194   :  { %320 = vmatpush.msrb.mxu1 %v290_v25 }
 0x195   :  { %378 = vmatmul.msk.f32.vlgmr.msrb.gmra.mxu1 %vm301_vm2, %v294_v26 }
 0x212   :  { %v322_v28 = vpop.f32.mrf.mxu1 }
 0x213   :  { %v323_v29 = vadd.f32 %v322_v28, %v299_v27 }
 0x215   :  { %v326_v30 = vsel %vm325_vm3, %v323_v29, -inf }
 0x216   :  { %v327_v31 = vrot.slane %v326_v30, 4 }
 0x218   :  { %v328_v32 = vmax.f32 %v326_v30, %v327_v31 }
 0x21a   :  { %v329_v33 = vrot.slane %v328_v32, 2 }
 0x21c   :  { %v330_v34 = vmax.f32 %v328_v32, %v329_v33 }
 0x21e   :  { %v331_v35 = vrot.slane %v330_v34, 1 }
 0x220   :  { %v332_v36 = vmax.f32 %v330_v34, %v331_v35 }
 0x222   :  { %v333_v37 = vsub.f32 %v323_v29, %v332_v36 }
 0x224   :  { %v334_v38 = vmul.f32 1.442695, %v333_v37 }
 0x226   :  { %415 = vpow2.f32 %v334_v38 }
 0x22c   :  { %v416_v39 = vpop.eup %415 }
 0x22d   :  { %v336_v40 = vsel %vm325_vm3, %v416_v39, 0.0 }
 0x22e   :  { %v337_v41 = vrot.slane %v336_v40, 4 }
 0x230   :  { %v338_v42 = vadd.f32 %v337_v41, %v336_v40 }
 0x232   :  { %v339_v43 = vrot.slane %v338_v42, 2 }
 0x234   :  { %v340_v44 = vadd.f32 %v339_v43, %v338_v42 }
 0x236   :  { %v341_v45 = vrot.slane %v340_v44, 1 }
 0x238   :  { %v342_v46 = vadd.f32 %v341_v45, %v340_v44 }
 0x23a   :  { %417 = vrcp.f32 %v342_v46 }
 0x240   :  { %v418_v47 = vpop.eup %417 }
 0x241   :  { %v344_v48 = vmul.f32 %v418_v47, %v416_v39 }
 0x243   :  { %345 = vst [vmem:[%s652_s7] sm:$0x3] %v344_v48 }

</bundles_post_ra>
